<compile_context>
chip_gen: v7x
topology: tpu7x:2x2x1
jax: 0.10.0
libtpu: 0.0.40
codegen_flags: <defaults>
</compile_context>

<pallas_src>
import functools

import jax
import jax.numpy as jnp
from jax.experimental import pallas as pl
from jax.experimental.pallas import tpu as pltpu


def _round_up(x, m):
    return (x + m - 1) // m * m


def _row_granule(itemsize):
    # Sublane packing granule: 8 rows for f32, 16 for bf16, 32 for int8/fp8.
    return max(8, 32 // max(1, itemsize))


def _vmem_capacity_bytes():
    """Per-core VMEM capacity; falls back to 64 MiB (v7x, the smallest current
    generation) if the query is unavailable, so tiles never over-provision."""
    try:
        info = pltpu.get_tpu_info()
        cap = int(getattr(info, "vmem_capacity_bytes", 0) or 0)
        if cap > 0:
            return cap
    except Exception:
        pass
    return 64 << 20


def _choose_batch_tile(B, row_elems, itemsize, vmem_cap_bytes):
    """Batch-tile rows sized so the double-buffered (in + out) activation tiles use
    ~40% of this generation's per-core VMEM (HBM-streaming kernel -> big tiles),
    capped at ~ceil(B/2) so the "parallel" grid axis has >= 2 steps (v7x megacore),
    and rounded to the sublane packing granule."""
    granule = _row_granule(itemsize)
    budget = int(vmem_cap_bytes * 0.4)
    tb = budget // max(1, 4 * row_elems * itemsize)      # 4 = (in + out) x double-buffer
    tb = max(granule, (tb // granule) * granule)
    tb = min(tb, 4096)
    half = max(granule, _round_up(pl.cdiv(B, 2), granule))
    tb = min(tb, half)
    tb = min(tb, _round_up(B, granule))
    return tb


def mmtm_kernel(txt_ref, sk_ref,
                wsq_t_ref, wsq_e_ref, bsq_ref,
                wtxt_ref, btxt_ref,
                wsk_ref, bsk_ref,
                txt_out_ref, sk_out_ref, *, seq_len):
    txt = txt_ref[...]                                   # (TB, Dt), native dtype
    sk = sk_ref[...]                                     # (TB, T*De), native dtype, lane dense

    # fc_squeeze on cat([txt, mean_T(skeleton)], dim=1): the concat is folded into two
    # MXU contractions, and the temporal mean is folded into wsq_e_ref (ehr half of the
    # squeeze weight replicated T times along K, 1/T pre-applied), so the flattened
    # skeleton tile feeds the MXU directly — no cross-sublane XLU reduction.
    exc = (jnp.dot(txt, wsq_t_ref[...], preferred_element_type=jnp.float32)
           + jnp.dot(sk, wsq_e_ref[...], preferred_element_type=jnp.float32)
           + bsq_ref[...])                               # (TB, Dout) f32
    exc = jnp.maximum(exc, 0.0)                          # ReLU
    exc = exc.astype(wtxt_ref.dtype)                     # keep the bf16 MXU fast path if weights are bf16

    # fc_txt / fc_skeleton + sigmoid gates (f32 accumulation).
    t_gate = jax.nn.sigmoid(
        jnp.dot(exc, wtxt_ref[...], preferred_element_type=jnp.float32) + btxt_ref[...])
    s_gate = jax.nn.sigmoid(
        jnp.dot(exc, wsk_ref[...], preferred_element_type=jnp.float32) + bsk_ref[...])

    # Gating multiplies in the native input dtype on the VPU.
    txt_out_ref[...] = (txt * t_gate.astype(txt.dtype)).astype(txt_out_ref.dtype)
    # Broadcasting the per-feature gate over T in the flattened layout == lane tile.
    s_gate_rep = jnp.tile(s_gate.astype(sk.dtype), (1, seq_len))     # (TB, T*De)
    sk_out_ref[...] = (sk * s_gate_rep).astype(sk_out_ref.dtype)


def prepare_params(params, dim_txt, seq_len, dtype=jnp.float32):
    """One-time transform of PyTorch-layout params into kernel-ready layout.

    Splits fc_squeeze's weight into its txt / ehr halves, transposes to (in, out),
    folds the 1/T of the temporal mean into the ehr half, and replicates that half
    T times along the contraction axis so the kernel consumes the (B, T*De)-flattened
    skeleton directly on the MXU. Weights are stored in the activation dtype; biases
    stay f32 (they are added to f32 accumulators).
    """
    w_sq, b_sq, w_txt, b_txt, w_sk, b_sk = params                     # PyTorch (out, in)
    wsq_t = jnp.transpose(w_sq[:, :dim_txt]).astype(dtype)            # (Dt, Dout)
    wsq_e = jnp.transpose(w_sq[:, dim_txt:]) / float(seq_len)         # (De, Dout), 1/T folded
    wsq_e_rep = jnp.concatenate([wsq_e] * seq_len, axis=0).astype(dtype)  # (T*De, Dout)
    wtxt = jnp.transpose(w_txt).astype(dtype)                         # (Dout, Dt)
    wsk = jnp.transpose(w_sk).astype(dtype)                           # (Dout, De)
    return (wsq_t, wsq_e_rep,
            b_sq.reshape(1, -1).astype(jnp.float32),
            wtxt, b_txt.reshape(1, -1).astype(jnp.float32),
            wsk, b_sk.reshape(1, -1).astype(jnp.float32))


@functools.partial(jax.jit, static_argnames=("tb", "vmem_limit"))
def _mmtm_n_call(txt, skeleton, prepared_params, *, tb, vmem_limit):
    B, Dt = txt.shape
    _, T, De = skeleton.shape
    F = T * De
    wsq_t, wsq_e_rep, bsq, wtxt, btxt, wsk, bsk = prepared_params
    Dout = wsq_t.shape[1]

    # Contiguous flatten: layout no-op inside XLA, gives lane-dense (B, T*De) tiles.
    sk2d = skeleton.reshape(B, F)

    grid = (pl.cdiv(B, tb),)   # ragged last tile handled by Pallas (OOB writes dropped)

    in_specs = [
        pl.BlockSpec((tb, Dt), lambda i: (i, 0)),          # txt tile
        pl.BlockSpec((tb, F), lambda i: (i, 0)),           # flattened skeleton tile
        pl.BlockSpec((Dt, Dout), lambda i: (0, 0)),        # wsq_t (resident)
        pl.BlockSpec((F, Dout), lambda i: (0, 0)),         # wsq_e_rep (1/T folded, resident)
        pl.BlockSpec((1, Dout), lambda i: (0, 0)),         # b_sq
        pl.BlockSpec((Dout, Dt), lambda i: (0, 0)),        # w_txt
        pl.BlockSpec((1, Dt), lambda i: (0, 0)),           # b_txt
        pl.BlockSpec((Dout, De), lambda i: (0, 0)),        # w_sk
        pl.BlockSpec((1, De), lambda i: (0, 0)),           # b_sk
    ]
    out_specs = (
        pl.BlockSpec((tb, Dt), lambda i: (i, 0)),
        pl.BlockSpec((tb, F), lambda i: (i, 0)),
    )

    itemsize = jnp.dtype(skeleton.dtype).itemsize
    w_bytes = sum(int(w.size) * jnp.dtype(w.dtype).itemsize for w in prepared_params)
    cost = pl.CostEstimate(
        flops=2 * B * Dout * (Dt + F + Dt + De),
        transcendentals=B * (Dt + De),                     # sigmoid exps
        bytes_accessed=2 * B * (Dt + F) * itemsize + w_bytes)

    txt_out, sk2d_out = pl.pallas_call(
        functools.partial(mmtm_kernel, seq_len=T),
        grid=grid,
        in_specs=in_specs,
        out_specs=out_specs,
        out_shape=(jax.ShapeDtypeStruct((B, Dt), txt.dtype),
                   jax.ShapeDtypeStruct((B, F), skeleton.dtype)),
        compiler_params=pltpu.CompilerParams(
            dimension_semantics=("parallel",),
            vmem_limit_bytes=int(vmem_limit)),
        cost_estimate=cost,
    )(txt, sk2d, wsq_t, wsq_e_rep, bsq, wtxt, btxt, wsk, bsk)

    return txt_out, sk2d_out.reshape(B, T, De)


def mmtm_n(txt, skeleton, prepared_params, *, tb=None):
    """Pallas implementation of MMTM_N.forward (lane-dense, batch-tiled, pipelined)."""
    B, Dt = txt.shape
    _, T, De = skeleton.shape
    F = T * De
    itemsize = jnp.dtype(skeleton.dtype).itemsize
    cap = _vmem_capacity_bytes()

    if tb is None:
        tb = _choose_batch_tile(B, F + Dt, itemsize, cap)
    granule = _row_granule(itemsize)
    tb = max(granule, _round_up(int(tb), granule))
    tb = min(tb, _round_up(B, granule))

    # Explicit scoped-VMEM limit: double-buffered in+out activation tiles + resident
    # weights + headroom, clamped to ~90% of this generation's per-core VMEM.
    w_bytes = sum(int(w.size) * jnp.dtype(w.dtype).itemsize for w in prepared_params)
    act_bytes = 4 * tb * (F + Dt) * itemsize
    vmem_limit = min(int(cap * 0.9), max(32 << 20, act_bytes + w_bytes + (8 << 20)))

    return _mmtm_n_call(txt, skeleton, prepared_params, tb=int(tb),
                        vmem_limit=int(vmem_limit))


def mmtm_n_ref(txt, skeleton, params):
    """Pure-JAX reference mirroring the PyTorch forward (raw PyTorch-layout params)."""
    w_sq, b_sq, w_txt, b_txt, w_sk, b_sk = params
    ehr_avg = jnp.mean(skeleton, axis=1)
    squeeze = jnp.concatenate([txt, ehr_avg], axis=1)
    exc = jax.nn.relu(squeeze @ w_sq.T + b_sq)
    t_gate = jax.nn.sigmoid(exc @ w_txt.T + b_txt)
    s_gate = jax.nn.sigmoid(exc @ w_sk.T + b_sk)
    return txt * t_gate, skeleton * s_gate[:, None, :]


def init_params(key, dim_txt, dim_ehr, ratio):
    """Deterministic init matching nn.Linear shapes (weight: (out, in))."""
    dim = dim_txt + dim_ehr
    dim_out = int(2 * dim / ratio)
    ks = jax.random.split(key, 6)

    def lin(kw, kb, out_f, in_f):
        bound = 1.0 / jnp.sqrt(in_f)
        w = jax.random.uniform(kw, (out_f, in_f), jnp.float32, -bound, bound)
        b = jax.random.uniform(kb, (out_f,), jnp.float32, -bound, bound)
        return w, b

    w_sq, b_sq = lin(ks[0], ks[1], dim_out, dim)
    w_txt, b_txt = lin(ks[2], ks[3], dim_txt, dim_out)
    w_sk, b_sk = lin(ks[4], ks[5], dim_ehr, dim_out)
    return (w_sq, b_sq, w_txt, b_txt, w_sk, b_sk)


if __name__ == "__main__":
    dim_txt, dim_ehr, ratio = 32, 32, 4

    key = jax.random.PRNGKey(0)
    k_txt, k_sk, k_p, k_txt2, k_sk2 = jax.random.split(key, 5)
    params = init_params(k_p, dim_txt, dim_ehr, ratio)

    # Tolerance accounts for TPU default f32 matmul precision (bf16 MXU passes) and the
    # folded-1/T reassociation between kernel and XLA reference; real logic bugs show
    # up as O(1) errors, far above this.
    atol = rtol = 2e-3

    # --- small case (module-sized): B=2, T=8, T*De = 256 (lane dense) ---
    B, T = 2, 8
    txt = jax.random.normal(k_txt, (B, dim_txt), jnp.float32)
    skeleton = jax.random.normal(k_sk, (B, T, dim_ehr), jnp.float32)
    prepared = prepare_params(params, dim_txt, T)

    txt_out, sk_out = mmtm_n(txt, skeleton, prepared)
    jax.block_until_ready((txt_out, sk_out))

    txt_r, sk_r = mmtm_n_ref(txt, skeleton, params)
    assert txt_out.shape == (B, dim_txt)
    assert sk_out.shape == (B, T, dim_ehr)
    assert jnp.allclose(txt_out, txt_r, atol=atol, rtol=rtol)
    assert jnp.allclose(sk_out, sk_r, atol=atol, rtol=rtol)

    # --- multi-tile case: auto tile -> 2 grid steps, ragged last batch tile (B=20) ---
    B2, T2 = 20, 8
    txt2 = jax.random.normal(k_txt2, (B2, dim_txt), jnp.float32)
    skeleton2 = jax.random.normal(k_sk2, (B2, T2, dim_ehr), jnp.float32)
    prepared2 = prepare_params(params, dim_txt, T2)

    txt_out2, sk_out2 = mmtm_n(txt2, skeleton2, prepared2)
    jax.block_until_ready((txt_out2, sk_out2))

    txt_r2, sk_r2 = mmtm_n_ref(txt2, skeleton2, params)
    assert txt_out2.shape == (B2, dim_txt)
    assert sk_out2.shape == (B2, T2, dim_ehr)
    assert jnp.allclose(txt_out2, txt_r2, atol=atol, rtol=rtol)
    assert jnp.allclose(sk_out2, sk_r2, atol=atol, rtol=rtol)

    # --- explicit small tile: 3-step grid, ragged last tile ---
    txt_out3, sk_out3 = mmtm_n(txt2, skeleton2, prepared2, tb=8)
    jax.block_until_ready((txt_out3, sk_out3))
    assert jnp.allclose(txt_out3, txt_r2, atol=atol, rtol=rtol)
    assert jnp.allclose(sk_out3, sk_r2, atol=atol, rtol=rtol)

    print("KERNEL_OK")
</pallas_src>

<mosaic_0001>
module attributes {stable_mosaic.version = 11 : i64} {
  func.func @mmtm_kernel(%arg0: i32, %arg1: memref<8x32xf32, #tpu.memory_space<vmem>>, %arg2: memref<8x256xf32, #tpu.memory_space<vmem>>, %arg3: memref<32x32xf32, #tpu.memory_space<vmem>>, %arg4: memref<256x32xf32, #tpu.memory_space<vmem>>, %arg5: memref<1x32xf32, #tpu.memory_space<vmem>>, %arg6: memref<32x32xf32, #tpu.memory_space<vmem>>, %arg7: memref<1x32xf32, #tpu.memory_space<vmem>>, %arg8: memref<32x32xf32, #tpu.memory_space<vmem>>, %arg9: memref<1x32xf32, #tpu.memory_space<vmem>>, %arg10: memref<8x32xf32, #tpu.memory_space<vmem>>, %arg11: memref<8x256xf32, #tpu.memory_space<vmem>>) attributes {dimension_semantics = [#tpu.dimension_semantics<parallel>], iteration_bounds = array<i64: 1>, scalar_prefetch = 0 : i64, scratch_operands = 0 : i64, tpu.core_type = #tpu.core_type<tc>, window_params = [{transform_indices = @transform_0, window_bounds = array<i64: 8, 32>}, {transform_indices = @transform_1, window_bounds = array<i64: 8, 256>}, {pipeline_mode = #tpu.pipeline_mode<synchronous>, transform_indices = @transform_2, window_bounds = array<i64: 32, 32>}, {pipeline_mode = #tpu.pipeline_mode<synchronous>, transform_indices = @transform_3, window_bounds = array<i64: 256, 32>}, {pipeline_mode = #tpu.pipeline_mode<synchronous>, transform_indices = @transform_4, window_bounds = array<i64: 1, 32>}, {pipeline_mode = #tpu.pipeline_mode<synchronous>, transform_indices = @transform_5, window_bounds = array<i64: 32, 32>}, {pipeline_mode = #tpu.pipeline_mode<synchronous>, transform_indices = @transform_6, window_bounds = array<i64: 1, 32>}, {pipeline_mode = #tpu.pipeline_mode<synchronous>, transform_indices = @transform_7, window_bounds = array<i64: 32, 32>}, {pipeline_mode = #tpu.pipeline_mode<synchronous>, transform_indices = @transform_8, window_bounds = array<i64: 1, 32>}, {transform_indices = @transform_9, window_bounds = array<i64: 8, 32>}, {transform_indices = @transform_10, window_bounds = array<i64: 8, 256>}]} {
    %c0 = arith.constant 0 : index
    %c0_0 = arith.constant 0 : index
    %0 = vector.load %arg1[%c0, %c0_0] : memref<8x32xf32, #tpu.memory_space<vmem>>, vector<8x32xf32>
    %c0_1 = arith.constant 0 : index
    %c0_2 = arith.constant 0 : index
    %1 = vector.load %arg2[%c0_1, %c0_2] : memref<8x256xf32, #tpu.memory_space<vmem>>, vector<8x256xf32>
    %c0_3 = arith.constant 0 : index
    %c0_4 = arith.constant 0 : index
    %2 = vector.load %arg3[%c0_3, %c0_4] : memref<32x32xf32, #tpu.memory_space<vmem>>, vector<32x32xf32>
    %cst = arith.constant dense<0.000000e+00> : vector<8x32xf32>
    %3 = tpu.matmul %0, %2, %cst {dimension_numbers = #tpu.dot_dimension_numbers<[1], [0], [0], [1], [0, 0, 1, 1], [], []>} : vector<8x32xf32>, vector<32x32xf32>, vector<8x32xf32> -> vector<8x32xf32>
    %c0_5 = arith.constant 0 : index
    %c0_6 = arith.constant 0 : index
    %4 = vector.load %arg4[%c0_5, %c0_6] : memref<256x32xf32, #tpu.memory_space<vmem>>, vector<256x32xf32>
    %cst_7 = arith.constant dense<0.000000e+00> : vector<8x32xf32>
    %5 = tpu.matmul %1, %4, %cst_7 {dimension_numbers = #tpu.dot_dimension_numbers<[1], [0], [0], [1], [0, 0, 1, 1], [], []>} : vector<8x256xf32>, vector<256x32xf32>, vector<8x32xf32> -> vector<8x32xf32>
    %6 = arith.addf %3, %5 : vector<8x32xf32>
    %c0_8 = arith.constant 0 : index
    %c0_9 = arith.constant 0 : index
    %7 = vector.load %arg5[%c0_8, %c0_9] : memref<1x32xf32, #tpu.memory_space<vmem>>, vector<1x32xf32>
    %8 = vector.broadcast %7 : vector<1x32xf32> to vector<8x32xf32>
    %9 = arith.addf %6, %8 : vector<8x32xf32>
    %cst_10 = arith.constant 0.000000e+00 : f32
    %10 = vector.broadcast %cst_10 : f32 to vector<8x32xf32>
    %11 = arith.maximumf %9, %10 : vector<8x32xf32>
    %c0_11 = arith.constant 0 : index
    %c0_12 = arith.constant 0 : index
    %12 = vector.load %arg6[%c0_11, %c0_12] : memref<32x32xf32, #tpu.memory_space<vmem>>, vector<32x32xf32>
    %cst_13 = arith.constant dense<0.000000e+00> : vector<8x32xf32>
    %13 = tpu.matmul %11, %12, %cst_13 {dimension_numbers = #tpu.dot_dimension_numbers<[1], [0], [0], [1], [0, 0, 1, 1], [], []>} : vector<8x32xf32>, vector<32x32xf32>, vector<8x32xf32> -> vector<8x32xf32>
    %c0_14 = arith.constant 0 : index
    %c0_15 = arith.constant 0 : index
    %14 = vector.load %arg7[%c0_14, %c0_15] : memref<1x32xf32, #tpu.memory_space<vmem>>, vector<1x32xf32>
    %15 = vector.broadcast %14 : vector<1x32xf32> to vector<8x32xf32>
    %16 = arith.addf %13, %15 : vector<8x32xf32>
    %17 = arith.negf %16 : vector<8x32xf32>
    %18 = math.exp %17 : vector<8x32xf32>
    %cst_16 = arith.constant 1.000000e+00 : f32
    %19 = vector.broadcast %cst_16 : f32 to vector<8x32xf32>
    %20 = arith.addf %19, %18 : vector<8x32xf32>
    %21 = arith.divf %19, %20 : vector<8x32xf32>
    %c0_17 = arith.constant 0 : index
    %c0_18 = arith.constant 0 : index
    %22 = vector.load %arg8[%c0_17, %c0_18] : memref<32x32xf32, #tpu.memory_space<vmem>>, vector<32x32xf32>
    %cst_19 = arith.constant dense<0.000000e+00> : vector<8x32xf32>
    %23 = tpu.matmul %11, %22, %cst_19 {dimension_numbers = #tpu.dot_dimension_numbers<[1], [0], [0], [1], [0, 0, 1, 1], [], []>} : vector<8x32xf32>, vector<32x32xf32>, vector<8x32xf32> -> vector<8x32xf32>
    %c0_20 = arith.constant 0 : index
    %c0_21 = arith.constant 0 : index
    %24 = vector.load %arg9[%c0_20, %c0_21] : memref<1x32xf32, #tpu.memory_space<vmem>>, vector<1x32xf32>
    %25 = vector.broadcast %24 : vector<1x32xf32> to vector<8x32xf32>
    %26 = arith.addf %23, %25 : vector<8x32xf32>
    %27 = arith.negf %26 : vector<8x32xf32>
    %28 = math.exp %27 : vector<8x32xf32>
    %cst_22 = arith.constant 1.000000e+00 : f32
    %29 = vector.broadcast %cst_22 : f32 to vector<8x32xf32>
    %30 = arith.addf %29, %28 : vector<8x32xf32>
    %31 = arith.divf %29, %30 : vector<8x32xf32>
    %32 = arith.mulf %0, %21 : vector<8x32xf32>
    %c0_23 = arith.constant 0 : index
    %c0_24 = arith.constant 0 : index
    %33 = vector.load %arg10[%c0_23, %c0_24] : memref<8x32xf32, #tpu.memory_space<vmem>>, vector<8x32xf32>
    tpu.vector_store %arg10[%c0_23, %c0_24], %32 {strides = array<i32>} : memref<8x32xf32, #tpu.memory_space<vmem>>, vector<8x32xf32>,
    %34 = tpu.concatenate %31, %31, %31, %31, %31, %31, %31, %31 in 1 : vector<8x32xf32>, vector<8x32xf32>, vector<8x32xf32>, vector<8x32xf32>, vector<8x32xf32>, vector<8x32xf32>, vector<8x32xf32>, vector<8x32xf32> -> vector<8x256xf32>
    %35 = arith.mulf %1, %34 : vector<8x256xf32>
    %c0_25 = arith.constant 0 : index
    %c0_26 = arith.constant 0 : index
    %36 = vector.load %arg11[%c0_25, %c0_26] : memref<8x256xf32, #tpu.memory_space<vmem>>, vector<8x256xf32>
    tpu.vector_store %arg11[%c0_25, %c0_26], %35 {strides = array<i32>} : memref<8x256xf32, #tpu.memory_space<vmem>>, vector<8x256xf32>,
    return
  }
  func.func @transform_0(%arg0: i32) -> (i32, i32) {
    %c0_i32 = arith.constant 0 : i32
    %c0_i32_0 = arith.constant 0 : i32
    return %arg0, %c0_i32 : i32, i32
  }
  func.func @transform_1(%arg0: i32) -> (i32, i32) {
    %c0_i32 = arith.constant 0 : i32
    %c0_i32_0 = arith.constant 0 : i32
    return %arg0, %c0_i32 : i32, i32
  }
  func.func @transform_2(%arg0: i32) -> (i32, i32) {
    %c0_i32 = arith.constant 0 : i32
    %c0_i32_0 = arith.constant 0 : i32
    %c0_i32_1 = arith.constant 0 : i32
    return %c0_i32, %c0_i32_0 : i32, i32
  }
  func.func @transform_3(%arg0: i32) -> (i32, i32) {
    %c0_i32 = arith.constant 0 : i32
    %c0_i32_0 = arith.constant 0 : i32
    %c0_i32_1 = arith.constant 0 : i32
    return %c0_i32, %c0_i32_0 : i32, i32
  }
  func.func @transform_4(%arg0: i32) -> (i32, i32) {
    %c0_i32 = arith.constant 0 : i32
    %c0_i32_0 = arith.constant 0 : i32
    %c0_i32_1 = arith.constant 0 : i32
    return %c0_i32, %c0_i32_0 : i32, i32
  }
  func.func @transform_5(%arg0: i32) -> (i32, i32) {
    %c0_i32 = arith.constant 0 : i32
    %c0_i32_0 = arith.constant 0 : i32
    %c0_i32_1 = arith.constant 0 : i32
    return %c0_i32, %c0_i32_0 : i32, i32
  }
  func.func @transform_6(%arg0: i32) -> (i32, i32) {
    %c0_i32 = arith.constant 0 : i32
    %c0_i32_0 = arith.constant 0 : i32
    %c0_i32_1 = arith.constant 0 : i32
    return %c0_i32, %c0_i32_0 : i32, i32
  }
  func.func @transform_7(%arg0: i32) -> (i32, i32) {
    %c0_i32 = arith.constant 0 : i32
    %c0_i32_0 = arith.constant 0 : i32
    %c0_i32_1 = arith.constant 0 : i32
    return %c0_i32, %c0_i32_0 : i32, i32
  }
  func.func @transform_8(%arg0: i32) -> (i32, i32) {
    %c0_i32 = arith.constant 0 : i32
    %c0_i32_0 = arith.constant 0 : i32
    %c0_i32_1 = arith.constant 0 : i32
    return %c0_i32, %c0_i32_0 : i32, i32
  }
  func.func @transform_9(%arg0: i32) -> (i32, i32) {
    %c0_i32 = arith.constant 0 : i32
    %c0_i32_0 = arith.constant 0 : i32
    return %arg0, %c0_i32 : i32, i32
  }
  func.func @transform_10(%arg0: i32) -> (i32, i32) {
    %c0_i32 = arith.constant 0 : i32
    %c0_i32_0 = arith.constant 0 : i32
    return %arg0, %c0_i32 : i32, i32
  }
}

</mosaic_0001>

<bundles_post_ra>
// kernel: _mmtm_n_call.1
= control target key start
LH: loop header
LB: loop body
LE: loop exit
PB: predicated region body
PF: predicated region fallthrough
CT: control target
= control target key end

     0   :  { %16 = vsyncpa [#allocation3], 0  ;;  %v717_v6 = vmov 0.0|0.0   ;;  %vm718_vm0 = vmmov 0   ;;  %v719_v11 = vmov 0.0   ;;  %v85_v17 = vlaneseq  ;;  %s723_s27 = smov 64   ;;  %s985_s0 = inlined_call_operand.vmem [shape: f32[2,32], index: 0, kind: input, shape index: {}]   ;;  %s986_s1 = inlined_call_operand.vmem [shape: f32[2,256], index: 1, kind: input, shape index: {}]   ;;  %s987_s2 = inlined_call_operand.vmem [shape: f32[32,32], index: 2, kind: input, shape index: {}]   ;;  %s988_s3 = inlined_call_operand.vmem [shape: f32[256,32], index: 3, kind: input, shape index: {}]   ;;  %s989_s4 = inlined_call_operand.vmem [shape: f32[1,32], index: 4, kind: input, shape index: {}]   ;;  %s990_s5 = inlined_call_operand.vmem [shape: f32[32,32], index: 5, kind: input, shape index: {}]   ;;  %s991_s6 = inlined_call_operand.vmem [shape: f32[1,32], index: 6, kind: input, shape index: {}]   ;;  %s992_s7 = inlined_call_operand.vmem [shape: f32[32,32], index: 7, kind: input, shape index: {}]   ;;  %s993_s8 = inlined_call_operand.vmem [shape: f32[1,32], index: 8, kind: input, shape index: {}]   ;;  %s994_s9 = inlined_call_operand.hbm [shape: f32[2,32], index: 9, kind: output, shape index: {0}]   ;;  %s995_s10 = inlined_call_operand.vmem [shape: f32[2,256], index: 10, kind: output, shape index: {1}]  }
   0x1   :  { %v60_v0 = vld [vmem:[%s988_s3 + $0x80] sm:$0xff]  ;;  %v61_v1 = vld [vmem:[%s988_s3 + $0x88] sm:$0xff]  ;;  %v62_v5 = vld [vmem:[%s988_s3 + $0x90] sm:$0xff]  ;;  %656 = vmatprep.subr.bf16.mxu1 %v717_v6  ;;  %599 = vmatprep.mubr.msk.f32.mxu1 %vm718_vm0, %v719_v11  ;;  %v720_v15 = vmov 1983009808   ;;  %vm170_vm1 = vcmask 261120  }
   0x2   :  { %v624_v2 = vpack.c.bf16 %v61_v1, %v60_v0  ;;  %v44_v3 = vld [vmem:[%s988_s3] sm:$0xff]  ;;  %v45_v4 = vld [vmem:[%s988_s3 + $0x8] sm:$0xff]  ;;  %v63_v8 = vld [vmem:[%s988_s3 + $0x98] sm:$0xff]  ;;  %v83_v16 = vunpack.c.l.s4 %v720_v15  ;;  %v86_v25 = vshrl.u32 %v85_v17, 7  ;;  %vm443_vm2 = vcmask 523264  }
   0x3   :  { %v626_v7 = vpack.c.bf16 %v45_v4, %v44_v3  ;;  %v46_v9 = vld [vmem:[%s988_s3 + $0x10] sm:$0xff]  ;;  %v47_v10 = vld [vmem:[%s988_s3 + $0x18] sm:$0xff]  ;;  %v628_v12 = vpack.c.bf16 %v63_v8, %v62_v5  ;;  %v64_v13 = vld [vmem:[%s988_s3 + $0xa0] sm:$0xff]  ;;  %vm445_vm3 = vcmask 785408  }
   0x4   :  { %625 = vmatprep.subr.bf16.mxu0 %v624_v2  ;;  %v65_v14 = vld [vmem:[%s988_s3 + $0xa8] sm:$0xff]  ;;  %v630_v18 = vpack.c.bf16 %v47_v10, %v46_v9  ;;  %v48_v20 = vld [vmem:[%s988_s3 + $0x20] sm:$0xff]  ;;  %v66_v22 = vld [vmem:[%s988_s3 + $0xb0] sm:$0xff]  ;;  %v84_v24 = vunpack.c.0.s8 %v83_v16 }
   0x5   :  { %627 = vmatpush3.bf16.msra.mxu0 %v626_v7  ;;  %v632_v19 = vpack.c.bf16 %v65_v14, %v64_v13  ;;  %v49_v21 = vld [vmem:[%s988_s3 + $0x28] sm:$0xff]  ;;  %v67_v23 = vld [vmem:[%s988_s3 + $0xb8] sm:$0xff]  ;;  %v50_v28 = vld [vmem:[%s988_s3 + $0x30] sm:$0xff] }
   0x6   :  { %629 = vmatprep.subr.bf16.mxu0 %v628_v12  ;;  %v634_v26 = vpack.c.bf16 %v49_v21, %v48_v20  ;;  %v636_v27 = vpack.c.bf16 %v67_v23, %v66_v22  ;;  %v51_v29 = vld [vmem:[%s988_s3 + $0x38] sm:$0xff]  ;;  %v40_v30 = vld [vmem:[%s987_s2] sm:$0xff]  ;;  %v69_v32 = vld [vmem:[%s988_s3 + $0xc8] sm:$0xff]  ;;  %v852_v37 = vsub.s32 %v84_v24, %v86_v25 }
   0x7   :  { %v68_v31 = vld [vmem:[%s988_s3 + $0xc0] sm:$0xff]  ;;  %v41_v33 = vld [vmem:[%s987_s2 + $0x8] sm:$0xff]  ;;  %v638_v38 = vpack.c.bf16 %v51_v29, %v50_v28  ;;  %v42_v46 = vld [vmem:[%s987_s2 + $0x10] sm:$0xff] }
   0x8   :  { %v52_v34 = vld [vmem:[%s988_s3 + $0x40] sm:$0xff]  ;;  %v657_v35 = vpack.c.bf16 %v41_v33, %v40_v30  ;;  %v38_v40 = vld [vmem:[%s986_s1 + $0x8] sm:$0xf]  ;;  %v39_v41 = vld [vmem:[%s986_s1 + $0xc] sm:$0xf]  ;;  %v640_v42 = vpack.c.bf16 %v69_v32, %v68_v31 }
   0x9   :  { %631 = vmatpush3.bf16.msra.mxu0 %v630_v18  ;;  %v850_v36 = vld [vmem:[%s986_s1] sm:$0xf]  ;;  %v37_v39 = vld [vmem:[%s986_s1 + $0x4] sm:$0xf]  ;;  %v53_v43 = vld [vmem:[%s988_s3 + $0x48] sm:$0xff]  ;;  %v81_v45 = vcombine.low %v38_v40, %v39_v41 }
   0xa   :  { %633 = vmatprep.subr.bf16.mxu0 %v632_v19  ;;  %658 = vmatpush3.bf16.msra.mxu1 %v657_v35  ;;  %v80_v44 = vcombine.low %v850_v36, %v37_v39  ;;  %v43_v47 = vld [vmem:[%s987_s2 + $0x18] sm:$0xff]  ;;  %v70_v48 = vld [vmem:[%s988_s3 + $0xd0] sm:$0xff]  ;;  %v642_v53 = vpack.c.bf16 %v53_v43, %v52_v34  ;;  %v891_v58 = vld [vmem:[%s985_s0] sm:$0xff] }
   0xb   :  { %v71_v49 = vld [vmem:[%s988_s3 + $0xd8] sm:$0xff]  ;;  %659 = vmatprep.subr.bf16.mxu1 %v717_v6  ;;  %v660_v50 = vpack.c.bf16 %v43_v47, %v42_v46  ;;  %v95_v52 = vrot.slane %v81_v45, %v852_v37  ;;  %v54_v55 = vld [vmem:[%s988_s3 + $0x50] sm:$0xff]  ;;  %v72_v59 = vld [vmem:[%s988_s3 + $0xe0] sm:$0xff] }
   0xc   :  { %v88_v51 = vrot.slane %v80_v44, %v852_v37  ;;  %v644_v54 = vpack.c.bf16 %v71_v49, %v70_v48  ;;  %v55_v56 = vld [vmem:[%s988_s3 + $0x58] sm:$0xff]  ;;  %v73_v60 = vld [vmem:[%s988_s3 + $0xe8] sm:$0xff]  ;;  %v56_v63 = vld [vmem:[%s988_s3 + $0x60] sm:$0xff] }
   0xd   :  { %635 = vmatpush3.bf16.msra.mxu0 %v634_v26  ;;  %v646_v61 = vpack.c.bf16 %v55_v56, %v54_v55  ;;  %v648_v62 = vpack.c.bf16 %v73_v60, %v72_v59  ;;  %v57_v0 = vld [vmem:[%s988_s3 + $0x68] sm:$0xff]  ;;  %v74_v1 = vld [vmem:[%s988_s3 + $0xf0] sm:$0xff]  ;;  %v75_v2 = vld [vmem:[%s988_s3 + $0xf8] sm:$0xff] }
   0xe   :  { %637 = vmatprep.subr.bf16.mxu0 %v636_v27  ;;  %v97_v57 = vcombine.high %v88_v51, %v95_v52  ;;  %661 = vmatpush3.bf16.msra.mxu1 %v660_v50  ;;  %v650_v3 = vpack.c.bf16 %v57_v0, %v56_v63  ;;  %v652_v4 = vpack.c.bf16 %v75_v2, %v74_v1  ;;  %v58_v5 = vld [vmem:[%s988_s3 + $0x70] sm:$0xff]  ;;  %v59_v7 = vld [vmem:[%s988_s3 + $0x78] sm:$0xff]  ;;  %v253_v10 = vld [vmem:[%s990_s5] sm:$0xff] }
   0xf   :  { %662 = vmatprep.subr.bf16.mxu1 %v717_v6  ;;  %v654_v8 = vpack.c.bf16 %v59_v7, %v58_v5  ;;  %v96_v9 = vcombine.low %v88_v51, %v95_v52  ;;  %v254_v12 = vld [vmem:[%s990_s5 + $0x8] sm:$0xff]  ;;  %v255_v14 = vld [vmem:[%s990_s5 + $0x10] sm:$0xff]  ;;  %v256_v15 = vld [vmem:[%s990_s5 + $0x18] sm:$0xff] }
  0x10   :  { %164 = vmatprep.mubr.f32.mxu0 %v97_v57  ;;  %v663_v13 = vpack.c.bf16 %v254_v12, %v253_v10  ;;  %v666_v16 = vpack.c.bf16 %v256_v15, %v255_v14  ;;  %v534_v22 = vld [vmem:[%s989_s4] ss:$0 sm:$0xff]  ;;  %v344_v25 = vld [vmem:[%s992_s7 + $0x8] sm:$0xff]  ;;  %v345_v29 = vld [vmem:[%s992_s7 + $0x10] sm:$0xff] }
  0x11   :  { %639 = vmatpush3.bf16.msra.mxu0 %v638_v38  ;;  %600 = vmatmul.mubr.msk.f32.vlgmr.msra.gmra.mrb[0].mxu1 %vm170_vm1, %v891_v58  ;;  %v343_v24 = vld [vmem:[%s992_s7] sm:$0xff]  ;;  %v346_v30 = vld [vmem:[%s992_s7 + $0x18] sm:$0xff] }
  0x12   :  { %641 = vmatprep.subr.bf16.mxu0 %v640_v42  ;;  %610 = vmatprep.mubr.msk.f32.mxu1 %vm718_vm0, %v719_v11  ;;  %v669_v27 = vpack.c.bf16 %v344_v25, %v343_v24  ;;  %v672_v31 = vpack.c.bf16 %v346_v30, %v345_v29  ;;  %v535_v32 = vld [vmem:[%s991_s6] ss:$0 sm:$0xff]  ;;  %s721_s6 = smov 96  }
  0x13   :  { %664 = vmatpush3.bf16.msra.mxu1 %v663_v13  ;;  %v538_v39 = vld [vmem:[%s993_s8] ss:$0 sm:$0xff]  ;;  %s722_s8 = smov 32  }
  0x14   :  { %665 = vmatprep.subr.bf16.mxu1 %v717_v6 }
  0x15   :  { %643 = vmatpush3.bf16.msra.mxu0 %v642_v53 }
  0x16   :  { %645 = vmatprep.subr.bf16.mxu0 %v644_v54 }
  0x17   :  { %667 = vmatpush3.bf16.msra.mxu1 %v666_v16 }
  0x18   :  { %668 = vmatprep.subr.bf16.mxu1 %v717_v6 }
  0x19   :  { %647 = vmatpush3.bf16.msra.mxu0 %v646_v61 }
  0x1a   :  { %649 = vmatprep.subr.bf16.mxu0 %v648_v62 }
  0x1d   :  { %651 = vmatpush3.bf16.msra.mxu0 %v650_v3 }
  0x1e   :  { %653 = vmatprep.subr.bf16.mxu0 %v652_v4 }
  0x21   :  { %655 = vmatpush3.bf16.msra.mxu0 %v654_v8 }
  0x24   :  { %165 = vmatmul.mubr.f32.vlgmr.msra.gmra.mrb[0].mxu0 %v96_v9 }
  0xe4   :  { %v240_v17 = vpop.f32.mrb[0].mxu1 }
  0xe5   :  { %v601_v18 = vpop.f32.mrb[1].mxu1 }
  0xf7   :  { %v573_v19 = vpop.f32.mrb[0].mxu0 }
  0xf8   :  { %v574_v20 = vpop.f32.mrb[1].mxu0 }
  0xf9   :  { %v575_v21 = vadd.f32 %v574_v20, %v573_v19 }
  0xfb   :  { %v241_v23 = vadd.f32 %v575_v21, %v240_v17 }
  0xfd   :  { %v251_v26 = vadd.f32 %v534_v22, %v241_v23 }
  0xff   :  { %v252_v28 = vmax.f32 %v251_v26, 0.0 }
 0x101   :  { %611 = vmatmul.mubr.msk.f32.vlgmr.msra.gmra.mrb[2].mxu1 %vm170_vm1, %v252_v28 }
 0x102   :  { %670 = vmatpush3.bf16.msra.mxu1 %v669_v27  ;;  %621 = vmatprep.mubr.msk.f32.mxu1 %vm718_vm0, %v719_v11 }
 0x103   :  { %671 = vmatprep.subr.bf16.mxu1 %v717_v6 }
 0x106   :  { %673 = vmatpush3.bf16.msra.mxu1 %v672_v31 }
 0x109   :  { %622 = vmatmul.mubr.msk.f32.vlgmr.msra.gmra.mrb[4].mxu1 %vm170_vm1, %v252_v28 }
 0x1d4   :  { %v333_v33 = vpop.f32.mrb[2].mxu1 }
 0x1d5   :  { %v334_v34 = vadd.f32 %v535_v32, %v333_v33  ;;  %v612_v35 = vpop.f32.mrb[3].mxu1 }
 0x1d7   :  { %v537_v38 = vmul.f32 -1.442695, %v334_v34 }
 0x1d9   :  { %685 = vpow2.f32 %v537_v38 }
 0x1dc   :  { %v420_v40 = vpop.f32.mrb[4].mxu1 }
 0x1dd   :  { %v421_v11 = vadd.f32 %v538_v39, %v420_v40  ;;  %v623_v41 = vpop.f32.mrb[5].mxu1 }
 0x1df   :  { %v540_v6 = vmul.f32 -1.442695, %v421_v11 }
 0x1e1   :  { %687 = vpow2.f32 %v540_v6 }
 0x1e3   :  { %v686_v42 = vpop.eup %685 }
 0x1e4   :  { %v340_v43 = vadd.f32 1.0, %v686_v42 }
 0x1e6   :  { %689 = vrcp.f32 %v340_v43 }
 0x1eb   :  { %v688_v44 = vpop.eup %687 }
 0x1ec   :  { %v427_v45 = vadd.f32 1.0, %v688_v44 }
 0x1ee   :  { %691 = vrcp.f32 %v427_v45 }
 0x1f0   :  { %v690_v46 = vpop.eup %689 }
 0x1f1   :  { %v430_v47 = vmul.f32 %v690_v46, %v891_v58 }
 0x1f3   :  { %431 = vst.msk [vmem:[#allocation2] sm:$0xff] %vm170_vm1, %v430_v47 }
 0x1f8   :  { %v692_v48 = vpop.eup %691 }
 0x1f9   :  { %439 = vrot.lane.b32.xlu1 %v692_v48, %s721_s6  ;;  %433 = vrot.lane.b32.xlu0 %v692_v48, %s722_s8 }
 0x1fd   :  { %436 = vrot.lane.b32.xlu0 %v692_v48, %s723_s27 }
 0x26b   :  { %v434_v49 = vpop.permute.xlu0 %433  ;;  %v440_v52 = vpop.permute.xlu1 %439 }
 0x26c   :  { %v442_v50 = vsel %vm170_vm1, %v692_v48, %v434_v49 }
 0x26f   :  { %v437_v51 = vpop.permute.xlu0 %436 }
 0x270   :  { %v444_v53 = vsel %vm443_vm2, %v442_v50, %v437_v51 }
 0x271   :  { %v446_v54 = vsel %vm445_vm3, %v444_v53, %v440_v52 }
 0x272   :  { %v448_v55 = vcombine.low %v446_v54, %v446_v54 }
 0x274   :  { %v456_v56 = vrot.slane %v448_v55, %v852_v37 }
 0x276   :  { %v470_v57 = vmul.f32 %v456_v56, %v850_v36 }
 0x278   :  { %474 = vst [vmem:[#allocation4] sm:$0xf] %v470_v57 }
 0x279   :  { %482 = vsyncadd [#allocation3], 96  ;;  %s724_s28 = smov [#allocation2]  }
 0x27a   :  { %s483_s29 = sshll.u32 %s724_s28, 4  ;;  %s484_s29 = int_to_ptr.vmem [resolvable:$true] %s483_s29 }
 0x27b   :  { %s693_s11 = scalar_lea.vmem %s484_s29, 32  ;;  %s697_s2 = scalar_lea.vmem %s484_s29, 128 }
 0x27c   :  { %p694_p0 = scmp.ne.s32.totalorder %s484_s29, %s693_s11  ;;  %p698_p1 = scmp.lt.s32.totalorder %s484_s29, %s484_s29 }
 0x27d   :  { %p699_p2 = scmp.lt.s32.totalorder %s697_s2, %s693_s11 }
 0x27f   :  { %v507_v58 = vld [vmem:[#allocation4] sm:$0xf]  ;;  %p700_p3 = por %p699_p2, %p698_p1 }
 0x280   :  { %508 = vst [vmem:[%s995_s10] sm:$0xf] %v507_v58 }
 0x281   :  { %p701_p4 = pnand %p700_p3, %p694_p0 }
 0x283   :  { %704 = shalt.err (!%p701_p4)
}
 0x284   :  { %s705_s14 = scalar_lea.hbm %s994_s9, 32 }
 0x285   :  { %p706_p5 = scmp.ne.s32.totalorder %s994_s9, %s705_s14  ;;  %p709_p6 = scmp.lt.u32.totalorder %s705_s14, %s994_s9 }
 0x287   :  { %p711_p7 = pnand %p709_p6, %p706_p5 }
 0x289   :  { %714 = shalt.err (!%p711_p7)
}
 0x28a   :  { %s725_s10 = smov 2  }
 0x28b   :  { %489 = dma.vmem_to_hbm [thread:$0]  %s484_s29, 32, %s994_s9, [#allocation3], %s722_s8, %s722_s8, %s725_s10  }
 0x28c   :  { %715 = dma.done.wait [#allocation3], 128  }
 0x28d   :  { %716 = vsyncadd [#allocation3], 4294967168 }
 0x28e   :  { %528 = vsyncpa [#allocation3], 1 }

</bundles_post_ra>
